<compile_context>
chip_gen: v7x
topology: tpu7x:2x2x1
jax: 0.10.0
libtpu: 0.0.40
codegen_flags: <defaults>
</compile_context>

<pallas_src>
import functools

import jax
import jax.numpy as jnp
from jax import lax
from jax.experimental import pallas as pl
from jax.experimental.pallas import tpu as pltpu


def _round_up(x, m):
    return (x + m - 1) // m * m


# dot_general dims for `a @ b.T` on 2-D operands (contract the last dims).
_CONTRACT_LAST = (((1,), (1,)), ((), ()))

# Safe double-buffered VMEM budget across v5e/v6e/v7x (v7x: 64 MiB physical).
_VMEM_BUDGET = 40 * 1024 * 1024
_VMEM_LIMIT_CAP = 56 * 1024 * 1024


def _lora_mid_kernel(x_ref, a_ref, mid_ref, acc_ref):
    """mid = x @ A.T, accumulated over the K grid axis (axis 1)."""
    k = pl.program_id(1)

    @pl.when(k == 0)
    def _():
        acc_ref[...] = jnp.zeros_like(acc_ref)

    acc_ref[...] += lax.dot_general(
        x_ref[...], a_ref[...], _CONTRACT_LAST,
        preferred_element_type=jnp.float32)

    @pl.when(k == pl.num_programs(1) - 1)
    def _():
        mid_ref[...] = acc_ref[...]


def _lora_main_kernel(x_ref, w_ref, mid_ref, b_ref, bias_ref, o_ref, acc_ref):
    """out = x @ W.T, with (mid @ B.T + bias) added only in the K epilogue."""
    k = pl.program_id(2)

    @pl.when(k == 0)
    def _():
        acc_ref[...] = jnp.zeros_like(acc_ref)

    acc_ref[...] += lax.dot_general(
        x_ref[...], w_ref[...], _CONTRACT_LAST,
        preferred_element_type=jnp.float32)

    @pl.when(k == pl.num_programs(2) - 1)
    def _():
        # mid and B are both f32 (B pre-cast in the wrapper); bias is f32.
        lora = lax.dot_general(
            mid_ref[...], b_ref[...], _CONTRACT_LAST,
            preferred_element_type=jnp.float32)
        o_ref[...] = (acc_ref[...] + lora + bias_ref[...]).astype(o_ref.dtype)


def _fit_tile(dim, tile, align, max_waste=1.12):
    """Clamp tile to the aligned problem size; shrink if padding waste > ~12%."""
    tile = min(tile, _round_up(dim, align))
    tile = max(tile, align)
    while tile > align and _round_up(dim, tile) > max_waste * dim + align:
        tile = _round_up(tile // 2, align)
    return tile


def _pass2_vmem_bytes(tm, tn, tk, r_pad, stream_bytes, out_bytes):
    """Double-buffered VMEM footprint of pass 2 (inputs + output + scratch)."""
    return (2 * tm * tk * stream_bytes          # x tile
            + 2 * tn * tk * stream_bytes        # W tile
            + 2 * tm * r_pad * 4                # mid tile (f32)
            + 2 * tn * r_pad * 4                # B tile (f32)
            + 2 * 8 * tn * 4                    # bias tile (sublane-padded)
            + 2 * tm * tn * out_bytes           # out tile
            + tm * tn * 4)                      # f32 accumulator scratch


@functools.partial(jax.jit,
                   static_argnames=("tm", "tn", "tk", "stream_dtype"))
def lora_linear(x, weight, A, B, bias, *, tm=512, tn=512, tk=1024,
                stream_dtype=None):
    """LoRA linear forward.

    x: (M, K); weight: (N, K); A: (r, K); B: (N, r); bias: (N,)
    Returns (M, N) in x.dtype.

    stream_dtype: optional dtype (e.g. jnp.bfloat16) used to stream x/W/A from
    HBM.  Accumulation stays in f32 and the result is cast once at the store.
    """
    M, K = x.shape
    N, _ = weight.shape
    r = A.shape[0]

    s_dtype = jnp.dtype(stream_dtype) if stream_dtype is not None \
        else jnp.dtype(x.dtype)
    s_bytes = s_dtype.itemsize
    out_bytes = jnp.dtype(x.dtype).itemsize

    # ---- Tile selection -------------------------------------------------
    # tm -> sublane axis (multiple of 8), tn/tk -> lane axes (multiple of 128).
    tm = _fit_tile(M, tm, 8)
    tn = _fit_tile(N, tn, 128)
    tk = _fit_tile(K, tk, 128)

    # VMEM budget clamp (protects user-supplied overrides on the 64 MiB v7x).
    while _pass2_vmem_bytes(tm, tn, tk, 128, s_bytes, out_bytes) > _VMEM_BUDGET:
        if tk > 128:
            tk = _round_up(tk // 2, 128)
        elif tn > 128:
            tn = _round_up(tn // 2, 128)
        elif tm > 8:
            tm = _round_up(tm // 2, 8)
        else:
            break

    M_pad = _round_up(M, tm)
    N_pad = _round_up(N, tn)
    K_pad = _round_up(K, tk)
    r_pad = _round_up(r, 128)  # lane-dense rank dimension for mid / B

    # v7x megacore guard: make sure at least one "parallel" axis has >= 2
    # blocks so both TensorCores get work (no-op on single-TC v5e/v6e).
    if M_pad // tm == 1 and N_pad // tn == 1:
        if N_pad % 256 == 0:
            tn = N_pad // 2
        elif M_pad % 16 == 0:
            tm = M_pad // 2
        M_pad = _round_up(M, tm)
        N_pad = _round_up(N, tn)

    grid_m = M_pad // tm
    grid_n = N_pad // tn

    # ---- Padding / dtype plumbing (wrapper side) -------------------------
    def pad2(a, rows, cols):
        pr, pc = rows - a.shape[0], cols - a.shape[1]
        if pr == 0 and pc == 0:
            return a
        return jnp.pad(a, ((0, pr), (0, pc)))

    xp = pad2(x, M_pad, K_pad).astype(s_dtype)
    wp = pad2(weight, N_pad, K_pad).astype(s_dtype)
    ap = pad2(A, r_pad, K_pad).astype(s_dtype)
    bp = pad2(B, N_pad, r_pad).astype(jnp.float32)      # pre-cast: f32 epilogue
    biasp = pad2(bias.astype(jnp.float32).reshape(1, N), 1, N_pad)

    # ---- VMEM limits (explicit; lifts v5e's 16 MiB default scoped limit) --
    est1 = (2 * tm * tk * s_bytes + 2 * r_pad * tk * s_bytes
            + 3 * tm * r_pad * 4)
    est2 = _pass2_vmem_bytes(tm, tn, tk, r_pad, s_bytes, out_bytes)
    vmem1 = int(min(max(est1 * 5 // 4 + (2 << 20), 32 << 20), _VMEM_LIMIT_CAP))
    vmem2 = int(min(max(est2 * 5 // 4 + (2 << 20), 32 << 20), _VMEM_LIMIT_CAP))

    # ---------------- Pass 1: mid = x @ A.T (f32) ----------------
    mid = pl.pallas_call(
        _lora_mid_kernel,
        out_shape=jax.ShapeDtypeStruct((M_pad, r_pad), jnp.float32),
        grid_spec=pltpu.PrefetchScalarGridSpec(
            num_scalar_prefetch=0,
            grid=(grid_m, K_pad // tk),
            in_specs=[
                pl.BlockSpec((tm, tk), lambda i, k: (i, k)),        # x
                pl.BlockSpec((r_pad, tk), lambda i, k: (0, k)),     # A (r, K)
            ],
            out_specs=pl.BlockSpec((tm, r_pad), lambda i, k: (i, 0)),
            scratch_shapes=[pltpu.VMEM((tm, r_pad), jnp.float32)],
        ),
        compiler_params=pltpu.CompilerParams(
            dimension_semantics=("parallel", "arbitrary"),
            vmem_limit_bytes=vmem1),
        cost_estimate=pl.CostEstimate(
            flops=2 * M * K * r_pad,
            transcendentals=0,
            bytes_accessed=(M * K + r_pad * K) * s_bytes + M * r_pad * 4),
    )(xp, ap)

    # ------- Pass 2: out = x @ W.T + mid @ B.T + bias -------
    out = pl.pallas_call(
        _lora_main_kernel,
        out_shape=jax.ShapeDtypeStruct((M_pad, N_pad), x.dtype),
        grid_spec=pltpu.PrefetchScalarGridSpec(
            num_scalar_prefetch=0,
            grid=(grid_m, grid_n, K_pad // tk),
            in_specs=[
                pl.BlockSpec((tm, tk), lambda i, j, k: (i, k)),      # x
                pl.BlockSpec((tn, tk), lambda i, j, k: (j, k)),      # W (N, K)
                pl.BlockSpec((tm, r_pad), lambda i, j, k: (i, 0)),   # mid (f32)
                pl.BlockSpec((tn, r_pad), lambda i, j, k: (j, 0)),   # B (f32)
                pl.BlockSpec((1, tn), lambda i, j, k: (0, j)),       # bias
            ],
            out_specs=pl.BlockSpec((tm, tn), lambda i, j, k: (i, j)),
            scratch_shapes=[pltpu.VMEM((tm, tn), jnp.float32)],
        ),
        compiler_params=pltpu.CompilerParams(
            dimension_semantics=("parallel", "parallel", "arbitrary"),
            vmem_limit_bytes=vmem2),
        cost_estimate=pl.CostEstimate(
            flops=2 * M * N * K + 2 * M * r_pad * N,
            transcendentals=0,
            # x and W are re-streamed grid_n / grid_m times respectively.
            bytes_accessed=(grid_n * M * K + grid_m * N * K) * s_bytes
            + grid_n * M * r_pad * 4
            + grid_m * (N * r_pad + N) * 4
            + M * N * out_bytes),
    )(xp, wp, mid, bp, biasp)

    return out[:M, :N]


if __name__ == "__main__":
    # ---- Small shapes consistent with the module: batch=8, in=32, out=16, r=4
    batch, in_features, out_features, r = 8, 32, 16, 4

    key = jax.random.PRNGKey(0)
    kx, kw, ka, kb, kx2, kw2, ka2, kb2 = jax.random.split(key, 8)

    x = jax.random.normal(kx, (batch, in_features), dtype=jnp.float32)

    # Deterministic parameter init mirroring LoRALinear.__init__:
    weight = jax.random.normal(kw, (out_features, in_features), dtype=jnp.float32)
    A = 0.01 * jax.random.normal(ka, (r, in_features), dtype=jnp.float32)
    B = jnp.zeros((out_features, r), dtype=jnp.float32)          # zeros at init
    bias = jnp.zeros((out_features,), dtype=jnp.float32)

    def reference(x, weight, A, B, bias):
        hi = lax.Precision.HIGHEST
        return (jnp.dot(x, weight.T, precision=hi)
                + bias
                + jnp.dot(x, jnp.dot(B, A, precision=hi).T, precision=hi))

    # 1) Module-faithful init (B == 0, LoRA path inactive), f32 streaming.
    out = jax.block_until_ready(lora_linear(x, weight, A, B, bias))
    ref = reference(x, weight, A, B, bias)
    assert out.shape == (batch, out_features)
    assert jnp.allclose(out, ref, atol=1e-4, rtol=1e-4), "mismatch (B=0)"

    # 2) Non-zero B / bias so the LoRA path is exercised, f32 streaming.
    B2 = jax.random.normal(kb, (out_features, r), dtype=jnp.float32)
    bias2 = 0.1 * jnp.arange(out_features, dtype=jnp.float32)
    out2 = jax.block_until_ready(lora_linear(x, weight, A, B2, bias2))
    ref2 = reference(x, weight, A, B2, bias2)
    assert jnp.allclose(out2, ref2, atol=1e-4, rtol=1e-4), "mismatch (B!=0)"

    # 3) Awkward mid-size shape: exercises K accumulation, padding-waste guard
    #    and the multi-block parallel grid. f32 streaming.
    M3, K3, N3, r3 = 300, 1500, 384, 8
    x3 = jax.random.normal(kx2, (M3, K3), dtype=jnp.float32)
    w3 = jax.random.normal(kw2, (N3, K3), dtype=jnp.float32) * 0.05
    A3 = 0.01 * jax.random.normal(ka2, (r3, K3), dtype=jnp.float32)
    B3 = jax.random.normal(kb2, (N3, r3), dtype=jnp.float32)
    bias3 = 0.01 * jnp.arange(N3, dtype=jnp.float32)
    out3 = jax.block_until_ready(lora_linear(x3, w3, A3, B3, bias3))
    ref3 = reference(x3, w3, A3, B3, bias3)
    assert jnp.allclose(out3, ref3, atol=2e-3, rtol=2e-3), "mismatch (mid-size)"

    # 4) bf16 streaming path (review item): compare against a reference that
    #    uses the same bf16-cast operands; accumulation is still f32.
    out4 = jax.block_until_ready(
        lora_linear(x3, w3, A3, B3, bias3, stream_dtype=jnp.bfloat16))
    ref4 = reference(x3.astype(jnp.bfloat16).astype(jnp.float32),
                     w3.astype(jnp.bfloat16).astype(jnp.float32),
                     A3.astype(jnp.bfloat16).astype(jnp.float32),
                     B3, bias3)
    assert jnp.allclose(out4, ref4, atol=1e-2, rtol=1e-2), "mismatch (bf16)"

    print("KERNEL_OK")
</pallas_src>

<mosaic_0001>
module attributes {stable_mosaic.version = 11 : i64} {
  func.func @_lora_mid_kernel(%arg0: i32, %arg1: i32, %arg2: memref<8x128xf32, #tpu.memory_space<vmem>>, %arg3: memref<128x128xf32, #tpu.memory_space<vmem>>, %arg4: memref<8x128xf32, #tpu.memory_space<vmem>>, %arg5: memref<8x128xf32, #tpu.memory_space<vmem>>) attributes {dimension_semantics = [#tpu.dimension_semantics<parallel>, #tpu.dimension_semantics<arbitrary>], iteration_bounds = array<i64: 1, 1>, scalar_prefetch = 0 : i64, scratch_operands = 1 : i64, tpu.core_type = #tpu.core_type<tc>, window_params = [{transform_indices = @transform_0, window_bounds = array<i64: 8, 128>}, {transform_indices = @transform_1, window_bounds = array<i64: 128, 128>}, {transform_indices = @transform_2, window_bounds = array<i64: 8, 128>}]} {
    %c0_i32 = arith.constant 0 : i32
    %0 = arith.cmpi eq, %arg1, %c0_i32 : i32
    %1 = arith.extui %0 : i1 to i32
    %c0_i32_0 = arith.constant 0 : i32
    %2 = arith.cmpi ne, %1, %c0_i32_0 : i32
    scf.if %2 {
      %cst_10 = arith.constant 0.000000e+00 : f32
      %12 = vector.broadcast %cst_10 : f32 to vector<8x128xf32>
      %c0_11 = arith.constant 0 : index
      %c0_12 = arith.constant 0 : index
      %13 = vector.load %arg5[%c0_11, %c0_12] : memref<8x128xf32, #tpu.memory_space<vmem>>, vector<8x128xf32>
      tpu.vector_store %arg5[%c0_11, %c0_12], %12 {strides = array<i32>} : memref<8x128xf32, #tpu.memory_space<vmem>>, vector<8x128xf32>,
    } else {
    }
    %c0 = arith.constant 0 : index
    %c0_1 = arith.constant 0 : index
    %3 = vector.load %arg5[%c0, %c0_1] : memref<8x128xf32, #tpu.memory_space<vmem>>, vector<8x128xf32>
    %c0_2 = arith.constant 0 : index
    %c0_3 = arith.constant 0 : index
    %4 = vector.load %arg2[%c0_2, %c0_3] : memref<8x128xf32, #tpu.memory_space<vmem>>, vector<8x128xf32>
    %c0_4 = arith.constant 0 : index
    %c0_5 = arith.constant 0 : index
    %5 = vector.load %arg3[%c0_4, %c0_5] : memref<128x128xf32, #tpu.memory_space<vmem>>, vector<128x128xf32>
    %cst = arith.constant dense<0.000000e+00> : vector<8x128xf32>
    %6 = tpu.matmul %4, %5, %cst {dimension_numbers = #tpu.dot_dimension_numbers<[1], [1], [0], [0], [0, 0, 1, 0], [], []>} : vector<8x128xf32>, vector<128x128xf32>, vector<8x128xf32> -> vector<8x128xf32>
    %7 = arith.addf %3, %6 : vector<8x128xf32>
    %c0_6 = arith.constant 0 : index
    %c0_7 = arith.constant 0 : index
    %8 = vector.load %arg5[%c0_6, %c0_7] : memref<8x128xf32, #tpu.memory_space<vmem>>, vector<8x128xf32>
    tpu.vector_store %arg5[%c0_6, %c0_7], %7 {strides = array<i32>} : memref<8x128xf32, #tpu.memory_space<vmem>>, vector<8x128xf32>,
    %c0_i32_8 = arith.constant 0 : i32
    %9 = arith.cmpi eq, %arg1, %c0_i32_8 : i32
    %10 = arith.extui %9 : i1 to i32
    %c0_i32_9 = arith.constant 0 : i32
    %11 = arith.cmpi ne, %10, %c0_i32_9 : i32
    scf.if %11 {
      %c0_10 = arith.constant 0 : index
      %c0_11 = arith.constant 0 : index
      %12 = vector.load %arg5[%c0_10, %c0_11] : memref<8x128xf32, #tpu.memory_space<vmem>>, vector<8x128xf32>
      %c0_12 = arith.constant 0 : index
      %c0_13 = arith.constant 0 : index
      %13 = vector.load %arg4[%c0_12, %c0_13] : memref<8x128xf32, #tpu.memory_space<vmem>>, vector<8x128xf32>
      tpu.vector_store %arg4[%c0_12, %c0_13], %12 {strides = array<i32>} : memref<8x128xf32, #tpu.memory_space<vmem>>, vector<8x128xf32>,
    } else {
    }
    return
  }
  func.func @transform_0(%arg0: i32, %arg1: i32) -> (i32, i32) {
    %c0_i32 = arith.constant 0 : i32
    return %arg0, %arg1 : i32, i32
  }
  func.func @transform_1(%arg0: i32, %arg1: i32) -> (i32, i32) {
    %c0_i32 = arith.constant 0 : i32
    %c0_i32_0 = arith.constant 0 : i32
    return %c0_i32, %arg1 : i32, i32
  }
  func.func @transform_2(%arg0: i32, %arg1: i32) -> (i32, i32) {
    %c0_i32 = arith.constant 0 : i32
    %c0_i32_0 = arith.constant 0 : i32
    return %arg0, %c0_i32 : i32, i32
  }
}

module attributes {stable_mosaic.version = 11 : i64} {
  func.func @_lora_main_kernel(%arg0: i32, %arg1: i32, %arg2: i32, %arg3: memref<8x128xf32, #tpu.memory_space<vmem>>, %arg4: memref<128x128xf32, #tpu.memory_space<vmem>>, %arg5: memref<8x128xf32, #tpu.memory_space<vmem>>, %arg6: memref<128x128xf32, #tpu.memory_space<vmem>>, %arg7: memref<1x128xf32, #tpu.memory_space<vmem>>, %arg8: memref<8x128xf32, #tpu.memory_space<vmem>>, %arg9: memref<8x128xf32, #tpu.memory_space<vmem>>) attributes {dimension_semantics = [#tpu.dimension_semantics<parallel>, #tpu.dimension_semantics<parallel>, #tpu.dimension_semantics<arbitrary>], iteration_bounds = array<i64: 1, 1, 1>, scalar_prefetch = 0 : i64, scratch_operands = 1 : i64, tpu.core_type = #tpu.core_type<tc>, window_params = [{transform_indices = @transform_0, window_bounds = array<i64: 8, 128>}, {transform_indices = @transform_1, window_bounds = array<i64: 128, 128>}, {transform_indices = @transform_2, window_bounds = array<i64: 8, 128>}, {transform_indices = @transform_3, window_bounds = array<i64: 128, 128>}, {transform_indices = @transform_4, window_bounds = array<i64: 1, 128>}, {transform_indices = @transform_5, window_bounds = array<i64: 8, 128>}]} {
    %c0_i32 = arith.constant 0 : i32
    %0 = arith.cmpi eq, %arg2, %c0_i32 : i32
    %1 = arith.extui %0 : i1 to i32
    %c0_i32_0 = arith.constant 0 : i32
    %2 = arith.cmpi ne, %1, %c0_i32_0 : i32
    scf.if %2 {
      %cst_10 = arith.constant 0.000000e+00 : f32
      %12 = vector.broadcast %cst_10 : f32 to vector<8x128xf32>
      %c0_11 = arith.constant 0 : index
      %c0_12 = arith.constant 0 : index
      %13 = vector.load %arg9[%c0_11, %c0_12] : memref<8x128xf32, #tpu.memory_space<vmem>>, vector<8x128xf32>
      tpu.vector_store %arg9[%c0_11, %c0_12], %12 {strides = array<i32>} : memref<8x128xf32, #tpu.memory_space<vmem>>, vector<8x128xf32>,
    } else {
    }
    %c0 = arith.constant 0 : index
    %c0_1 = arith.constant 0 : index
    %3 = vector.load %arg9[%c0, %c0_1] : memref<8x128xf32, #tpu.memory_space<vmem>>, vector<8x128xf32>
    %c0_2 = arith.constant 0 : index
    %c0_3 = arith.constant 0 : index
    %4 = vector.load %arg3[%c0_2, %c0_3] : memref<8x128xf32, #tpu.memory_space<vmem>>, vector<8x128xf32>
    %c0_4 = arith.constant 0 : index
    %c0_5 = arith.constant 0 : index
    %5 = vector.load %arg4[%c0_4, %c0_5] : memref<128x128xf32, #tpu.memory_space<vmem>>, vector<128x128xf32>
    %cst = arith.constant dense<0.000000e+00> : vector<8x128xf32>
    %6 = tpu.matmul %4, %5, %cst {dimension_numbers = #tpu.dot_dimension_numbers<[1], [1], [0], [0], [0, 0, 1, 0], [], []>} : vector<8x128xf32>, vector<128x128xf32>, vector<8x128xf32> -> vector<8x128xf32>
    %7 = arith.addf %3, %6 : vector<8x128xf32>
    %c0_6 = arith.constant 0 : index
    %c0_7 = arith.constant 0 : index
    %8 = vector.load %arg9[%c0_6, %c0_7] : memref<8x128xf32, #tpu.memory_space<vmem>>, vector<8x128xf32>
    tpu.vector_store %arg9[%c0_6, %c0_7], %7 {strides = array<i32>} : memref<8x128xf32, #tpu.memory_space<vmem>>, vector<8x128xf32>,
    %c0_i32_8 = arith.constant 0 : i32
    %9 = arith.cmpi eq, %arg2, %c0_i32_8 : i32
    %10 = arith.extui %9 : i1 to i32
    %c0_i32_9 = arith.constant 0 : i32
    %11 = arith.cmpi ne, %10, %c0_i32_9 : i32
    scf.if %11 {
      %c0_10 = arith.constant 0 : index
      %c0_11 = arith.constant 0 : index
      %12 = vector.load %arg5[%c0_10, %c0_11] : memref<8x128xf32, #tpu.memory_space<vmem>>, vector<8x128xf32>
      %c0_12 = arith.constant 0 : index
      %c0_13 = arith.constant 0 : index
      %13 = vector.load %arg6[%c0_12, %c0_13] : memref<128x128xf32, #tpu.memory_space<vmem>>, vector<128x128xf32>
      %cst_14 = arith.constant dense<0.000000e+00> : vector<8x128xf32>
      %14 = tpu.matmul %12, %13, %cst_14 {dimension_numbers = #tpu.dot_dimension_numbers<[1], [1], [0], [0], [0, 0, 1, 0], [], []>} : vector<8x128xf32>, vector<128x128xf32>, vector<8x128xf32> -> vector<8x128xf32>
      %c0_15 = arith.constant 0 : index
      %c0_16 = arith.constant 0 : index
      %15 = vector.load %arg9[%c0_15, %c0_16] : memref<8x128xf32, #tpu.memory_space<vmem>>, vector<8x128xf32>
      %16 = arith.addf %15, %14 : vector<8x128xf32>
      %c0_17 = arith.constant 0 : index
      %c0_18 = arith.constant 0 : index
      %17 = vector.load %arg7[%c0_17, %c0_18] : memref<1x128xf32, #tpu.memory_space<vmem>>, vector<1x128xf32>
      %18 = vector.broadcast %17 : vector<1x128xf32> to vector<8x128xf32>
      %19 = arith.addf %16, %18 : vector<8x128xf32>
      %c0_19 = arith.constant 0 : index
      %c0_20 = arith.constant 0 : index
      %20 = vector.load %arg8[%c0_19, %c0_20] : memref<8x128xf32, #tpu.memory_space<vmem>>, vector<8x128xf32>
      tpu.vector_store %arg8[%c0_19, %c0_20], %19 {strides = array<i32>} : memref<8x128xf32, #tpu.memory_space<vmem>>, vector<8x128xf32>,
    } else {
    }
    return
  }
  func.func @transform_0(%arg0: i32, %arg1: i32, %arg2: i32) -> (i32, i32) {
    %c0_i32 = arith.constant 0 : i32
    return %arg0, %arg2 : i32, i32
  }
  func.func @transform_1(%arg0: i32, %arg1: i32, %arg2: i32) -> (i32, i32) {
    %c0_i32 = arith.constant 0 : i32
    return %arg1, %arg2 : i32, i32
  }
  func.func @transform_2(%arg0: i32, %arg1: i32, %arg2: i32) -> (i32, i32) {
    %c0_i32 = arith.constant 0 : i32
    %c0_i32_0 = arith.constant 0 : i32
    return %arg0, %c0_i32 : i32, i32
  }
  func.func @transform_3(%arg0: i32, %arg1: i32, %arg2: i32) -> (i32, i32) {
    %c0_i32 = arith.constant 0 : i32
    %c0_i32_0 = arith.constant 0 : i32
    return %arg1, %c0_i32 : i32, i32
  }
  func.func @transform_4(%arg0: i32, %arg1: i32, %arg2: i32) -> (i32, i32) {
    %c0_i32 = arith.constant 0 : i32
    %c0_i32_0 = arith.constant 0 : i32
    return %c0_i32, %arg1 : i32, i32
  }
  func.func @transform_5(%arg0: i32, %arg1: i32, %arg2: i32) -> (i32, i32) {
    %c0_i32 = arith.constant 0 : i32
    return %arg0, %arg1 : i32, i32
  }
}

</mosaic_0001>

<bundles_post_ra>
// kernel: lora_linear.3
= control target key start
LH: loop header
LB: loop body
LE: loop exit
PB: predicated region body
PF: predicated region fallthrough
CT: control target
= control target key end

     0   :  { %v412_v3 = vmov 0.0|0.0   ;;  %vm413_vm0 = vmmov 0   ;;  %v414_v7 = vmov 0.0   ;;  %s579_s0 = inlined_call_operand.vmem [shape: f32[8,128], index: 0, kind: input, shape index: {}]   ;;  %s580_s1 = inlined_call_operand.vmem [shape: f32[128,128], index: 1, kind: input, shape index: {}]   ;;  %s581_s2 = inlined_call_operand.vmem [shape: f32[8,128], index: 2, kind: input, shape index: {}]   ;;  %s582_s3 = inlined_call_operand.vmem [shape: f32[128,128], index: 3, kind: input, shape index: {}]   ;;  %s583_s4 = inlined_call_operand.vmem [shape: f32[1,128], index: 4, kind: input, shape index: {}]   ;;  %s584_s5 = inlined_call_operand.hbm [shape: f32[8,128], index: 5, kind: output, shape index: {}]  }
   0x1   :  { %v28_v0 = vld [vmem:[%s580_s1] sm:$0xff]  ;;  %v29_v1 = vld [vmem:[%s580_s1 + $0x8] sm:$0xff]  ;;  %336 = vmatprep.subr.bf16.mxu0 %v412_v3  ;;  %360 = vmatprep.subr.bf16.mxu1 %v412_v3  ;;  %v30_v8 = vld [vmem:[%s580_s1 + $0x10] sm:$0xff] }
   0x2   :  { %v120_v2 = vld [vmem:[%s582_s3] sm:$0xff]  ;;  %v337_v4 = vpack.c.bf16 %v29_v1, %v28_v0  ;;  %v121_v5 = vld [vmem:[%s582_s3 + $0x8] sm:$0xff]  ;;  %298 = vmatprep.mubr.msk.f32.mxu0 %vm413_vm0, %v414_v7  ;;  %333 = vmatprep.mubr.msk.f32.mxu1 %vm413_vm0, %v414_v7  ;;  %v31_v9 = vld [vmem:[%s580_s1 + $0x18] sm:$0xff] }
   0x3   :  { %v361_v6 = vpack.c.bf16 %v121_v5, %v120_v2  ;;  %v122_v10 = vld [vmem:[%s582_s3 + $0x10] sm:$0xff]  ;;  %v123_v11 = vld [vmem:[%s582_s3 + $0x18] sm:$0xff]  ;;  %v340_v12 = vpack.c.bf16 %v31_v9, %v30_v8 }
   0x4   :  { %338 = vmatpush3.bf16.xpose.msra.mxu0 %v337_v4  ;;  %v364_v13 = vpack.c.bf16 %v123_v11, %v122_v10 }
   0x5   :  { %362 = vmatpush3.bf16.xpose.msra.mxu1 %v361_v6  ;;  %339 = vmatprep.subr.bf16.mxu0 %v412_v3 }
   0x6   :  { %363 = vmatprep.subr.bf16.mxu1 %v412_v3 }
   0xc   :  { %341 = vmatpush3.bf16.xpose.msra.mxu0 %v340_v12 }
   0xd   :  { %10 = vsyncpa [#allocation4], 0  ;;  %365 = vmatpush3.bf16.xpose.msra.mxu1 %v364_v13  ;;  %342 = vmatprep.subr.bf16.mxu0 %v412_v3  ;;  %v32_v14 = vld [vmem:[%s580_s1 + $0x20] sm:$0xff]  ;;  %v33_v15 = vld [vmem:[%s580_s1 + $0x28] sm:$0xff] }
   0xe   :  { %366 = vmatprep.subr.bf16.mxu1 %v412_v3  ;;  %v124_v16 = vld [vmem:[%s582_s3 + $0x20] sm:$0xff]  ;;  %v125_v17 = vld [vmem:[%s582_s3 + $0x28] sm:$0xff]  ;;  %v343_v18 = vpack.c.bf16 %v33_v15, %v32_v14  ;;  %v34_v20 = vld [vmem:[%s580_s1 + $0x30] sm:$0xff] }
   0xf   :  { %v367_v19 = vpack.c.bf16 %v125_v17, %v124_v16  ;;  %v35_v21 = vld [vmem:[%s580_s1 + $0x38] sm:$0xff]  ;;  %v126_v22 = vld [vmem:[%s582_s3 + $0x30] sm:$0xff]  ;;  %v36_v26 = vld [vmem:[%s580_s1 + $0x40] sm:$0xff] }
  0x10   :  { %v127_v23 = vld [vmem:[%s582_s3 + $0x38] sm:$0xff]  ;;  %v346_v24 = vpack.c.bf16 %v35_v21, %v34_v20  ;;  %v37_v27 = vld [vmem:[%s580_s1 + $0x48] sm:$0xff]  ;;  %v128_v28 = vld [vmem:[%s582_s3 + $0x40] sm:$0xff] }
  0x11   :  { %v370_v25 = vpack.c.bf16 %v127_v23, %v126_v22  ;;  %v129_v29 = vld [vmem:[%s582_s3 + $0x48] sm:$0xff]  ;;  %v349_v30 = vpack.c.bf16 %v37_v27, %v36_v26  ;;  %v38_v32 = vld [vmem:[%s580_s1 + $0x50] sm:$0xff]  ;;  %v39_v33 = vld [vmem:[%s580_s1 + $0x58] sm:$0xff] }
  0x12   :  { %v373_v31 = vpack.c.bf16 %v129_v29, %v128_v28  ;;  %v130_v34 = vld [vmem:[%s582_s3 + $0x50] sm:$0xff]  ;;  %v131_v35 = vld [vmem:[%s582_s3 + $0x58] sm:$0xff]  ;;  %v352_v36 = vpack.c.bf16 %v39_v33, %v38_v32  ;;  %v40_v38 = vld [vmem:[%s580_s1 + $0x60] sm:$0xff] }
  0x13   :  { %v376_v37 = vpack.c.bf16 %v131_v35, %v130_v34  ;;  %v41_v39 = vld [vmem:[%s580_s1 + $0x68] sm:$0xff]  ;;  %v132_v40 = vld [vmem:[%s582_s3 + $0x60] sm:$0xff]  ;;  %v42_v44 = vld [vmem:[%s580_s1 + $0x70] sm:$0xff] }
  0x14   :  { %344 = vmatpush3.bf16.xpose.msra.mxu0 %v343_v18  ;;  %v133_v41 = vld [vmem:[%s582_s3 + $0x68] sm:$0xff]  ;;  %v355_v42 = vpack.c.bf16 %v41_v39, %v40_v38  ;;  %v43_v45 = vld [vmem:[%s580_s1 + $0x78] sm:$0xff]  ;;  %v134_v46 = vld [vmem:[%s582_s3 + $0x70] sm:$0xff] }
  0x15   :  { %368 = vmatpush3.bf16.xpose.msra.mxu1 %v367_v19  ;;  %345 = vmatprep.subr.bf16.mxu0 %v412_v3  ;;  %v379_v43 = vpack.c.bf16 %v133_v41, %v132_v40  ;;  %v135_v47 = vld [vmem:[%s582_s3 + $0x78] sm:$0xff]  ;;  %v358_v48 = vpack.c.bf16 %v43_v45, %v42_v44  ;;  %v27_v50 = vld [vmem:[%s579_s0] sm:$0xff]  ;;  %s415_s3 = smov [#allocation3]  }
  0x16   :  { %369 = vmatprep.subr.bf16.mxu1 %v412_v3  ;;  %v382_v49 = vpack.c.bf16 %v135_v47, %v134_v46  ;;  %v119_v51 = vld [vmem:[%s581_s2] sm:$0xff]  ;;  %s223_s12 = sshll.u32 %s415_s3, 4  ;;  %s224_s12 = int_to_ptr.vmem [resolvable:$true] %s223_s12 }
  0x17   :  { %v231_v55 = vld [vmem:[%s583_s4] ss:$0 sm:$0xff]  ;;  %s388_s0 = scalar_lea.vmem %s224_s12, 128  ;;  %p393_p1 = scmp.lt.s32.totalorder %s224_s12, %s224_s12 }
  0x18   :  { %p389_p0 = scmp.ne.s32.totalorder %s224_s12, %s388_s0  ;;  %p394_p2 = scmp.lt.s32.totalorder %s388_s0, %s388_s0 }
  0x1a   :  { %p395_p3 = por %p394_p2, %p393_p1 }
  0x1c   :  { %347 = vmatpush3.bf16.xpose.msra.mxu0 %v346_v24  ;;  %p396_p4 = pnand %p395_p3, %p389_p0 }
  0x1d   :  { %371 = vmatpush3.bf16.xpose.msra.mxu1 %v370_v25  ;;  %348 = vmatprep.subr.bf16.mxu0 %v412_v3 }
  0x1e   :  { %372 = vmatprep.subr.bf16.mxu1 %v412_v3 }
  0x24   :  { %350 = vmatpush3.bf16.xpose.msra.mxu0 %v349_v30 }
  0x25   :  { %374 = vmatpush3.bf16.xpose.msra.mxu1 %v373_v31  ;;  %351 = vmatprep.subr.bf16.mxu0 %v412_v3 }
  0x26   :  { %375 = vmatprep.subr.bf16.mxu1 %v412_v3 }
  0x2c   :  { %353 = vmatpush3.bf16.xpose.msra.mxu0 %v352_v36 }
  0x2d   :  { %377 = vmatpush3.bf16.xpose.msra.mxu1 %v376_v37  ;;  %354 = vmatprep.subr.bf16.mxu0 %v412_v3 }
  0x2e   :  { %378 = vmatprep.subr.bf16.mxu1 %v412_v3 }
  0x34   :  { %356 = vmatpush3.bf16.xpose.msra.mxu0 %v355_v42 }
  0x35   :  { %380 = vmatpush3.bf16.xpose.msra.mxu1 %v379_v43  ;;  %357 = vmatprep.subr.bf16.mxu0 %v412_v3 }
  0x36   :  { %381 = vmatprep.subr.bf16.mxu1 %v412_v3 }
  0x3c   :  { %359 = vmatpush3.bf16.xpose.msra.mxu0 %v358_v48 }
  0x3d   :  { %383 = vmatpush3.bf16.xpose.msra.mxu1 %v382_v49 }
  0x43   :  { %299 = vmatmul.mubr.f32.vlgmr.msra.gmra.mrb[0].mxu0 %v27_v50 }
  0x44   :  { %334 = vmatmul.mubr.f32.vlgmr.msra.gmra.mrb[0].mxu1 %v119_v51 }
 0x116   :  { %v110_v52 = vpop.f32.mrb[0].mxu0 }
 0x117   :  { %v202_v53 = vpop.f32.mrb[0].mxu1  ;;  %v300_v54 = vpop.f32.mrb[1].mxu0 }
 0x118   :  { %v207_v56 = vadd.f32 %v202_v53, %v110_v52  ;;  %v335_v57 = vpop.f32.mrb[1].mxu1 }
 0x11a   :  { %v215_v58 = vadd.f32 %v231_v55, %v207_v56 }
 0x11c   :  { %216 = vst [vmem:[#allocation3] sm:$0xff] %v215_v58 }
 0x11d   :  { %399 = shalt.err (!%p396_p4)
}
 0x11e   :  { %s400_s14 = scalar_lea.hbm %s584_s5, 128 }
 0x11f   :  { %p401_p5 = scmp.ne.s32.totalorder %s584_s5, %s400_s14  ;;  %p404_p6 = scmp.lt.u32.totalorder %s400_s14, %s584_s5 }
 0x121   :  { %p406_p7 = pnand %p404_p6, %p401_p5 }
 0x123   :  { %409 = shalt.err (!%p406_p7)
}
 0x124   :  { %226 = dma.vmem_to_hbm [thread:$0]  %s224_s12, 128, %s584_s5, [#allocation4]  }
 0x125   :  { %410 = dma.done.wait [#allocation4], 128  }
 0x126   :  { %411 = vsyncadd [#allocation4], 4294967168 }
 0x127   :  { %230 = vsyncpa [#allocation4], 1 }

// kernel: lora_linear.2
= control target key start
LH: loop header
LB: loop body
LE: loop exit
PB: predicated region body
PF: predicated region fallthrough
CT: control target
= control target key end

     0   :  { %v194_v0 = vmov 0.0|0.0   ;;  %vm195_vm0 = vmmov 0   ;;  %v196_v3 = vmov 0.0   ;;  %s266_s1 = inlined_call_operand.vmem [shape: f32[128,128], index: 1, kind: input, shape index: {}]   ;;  %s267_s0 = inlined_call_operand.vmem [shape: f32[8,128], index: 0, kind: input, shape index: {}]   ;;  %s268_s2 = inlined_call_operand.vmem [shape: f32[8,128], index: 2, kind: output, shape index: {}]  }
   0x1   :  { %167 = vmatprep.subr.bf16.mxu0 %v194_v0  ;;  %v18_v1 = vld [vmem:[%s266_s1] sm:$0xff]  ;;  %v19_v2 = vld [vmem:[%s266_s1 + $0x8] sm:$0xff]  ;;  %164 = vmatprep.mubr.msk.f32.mxu0 %vm195_vm0, %v196_v3  ;;  %v20_v5 = vld [vmem:[%s266_s1 + $0x10] sm:$0xff] }
   0x2   :  { %v168_v4 = vpack.c.bf16 %v19_v2, %v18_v1  ;;  %v21_v6 = vld [vmem:[%s266_s1 + $0x18] sm:$0xff]  ;;  %v22_v8 = vld [vmem:[%s266_s1 + $0x20] sm:$0xff]  ;;  %v23_v9 = vld [vmem:[%s266_s1 + $0x28] sm:$0xff] }
   0x3   :  { %v171_v7 = vpack.c.bf16 %v21_v6, %v20_v5  ;;  %v174_v10 = vpack.c.bf16 %v23_v9, %v22_v8  ;;  %v24_v11 = vld [vmem:[%s266_s1 + $0x30] sm:$0xff]  ;;  %v25_v12 = vld [vmem:[%s266_s1 + $0x38] sm:$0xff]  ;;  %v26_v14 = vld [vmem:[%s266_s1 + $0x40] sm:$0xff] }
   0x4   :  { %169 = vmatpush3.bf16.xpose.msra.mxu0 %v168_v4  ;;  %v177_v13 = vpack.c.bf16 %v25_v12, %v24_v11  ;;  %v27_v15 = vld [vmem:[%s266_s1 + $0x48] sm:$0xff]  ;;  %v28_v17 = vld [vmem:[%s266_s1 + $0x50] sm:$0xff]  ;;  %v29_v18 = vld [vmem:[%s266_s1 + $0x58] sm:$0xff] }
   0x5   :  { %170 = vmatprep.subr.bf16.mxu0 %v194_v0  ;;  %v180_v16 = vpack.c.bf16 %v27_v15, %v26_v14  ;;  %v183_v19 = vpack.c.bf16 %v29_v18, %v28_v17  ;;  %v30_v20 = vld [vmem:[%s266_s1 + $0x60] sm:$0xff]  ;;  %v31_v21 = vld [vmem:[%s266_s1 + $0x68] sm:$0xff]  ;;  %v32_v23 = vld [vmem:[%s266_s1 + $0x70] sm:$0xff] }
   0x6   :  { %v186_v22 = vpack.c.bf16 %v31_v21, %v30_v20  ;;  %v33_v24 = vld [vmem:[%s266_s1 + $0x78] sm:$0xff]  ;;  %v17_v26 = vld [vmem:[%s267_s0] sm:$0xff] }
   0x7   :  { %v189_v25 = vpack.c.bf16 %v33_v24, %v32_v23 }
   0xc   :  { %172 = vmatpush3.bf16.xpose.msra.mxu0 %v171_v7 }
   0xd   :  { %173 = vmatprep.subr.bf16.mxu0 %v194_v0 }
  0x14   :  { %175 = vmatpush3.bf16.xpose.msra.mxu0 %v174_v10 }
  0x15   :  { %176 = vmatprep.subr.bf16.mxu0 %v194_v0 }
  0x1c   :  { %178 = vmatpush3.bf16.xpose.msra.mxu0 %v177_v13 }
  0x1d   :  { %179 = vmatprep.subr.bf16.mxu0 %v194_v0 }
  0x24   :  { %181 = vmatpush3.bf16.xpose.msra.mxu0 %v180_v16 }
  0x25   :  { %182 = vmatprep.subr.bf16.mxu0 %v194_v0 }
  0x2c   :  { %184 = vmatpush3.bf16.xpose.msra.mxu0 %v183_v19 }
  0x2d   :  { %185 = vmatprep.subr.bf16.mxu0 %v194_v0 }
  0x34   :  { %187 = vmatpush3.bf16.xpose.msra.mxu0 %v186_v22 }
  0x35   :  { %188 = vmatprep.subr.bf16.mxu0 %v194_v0 }
  0x3c   :  { %190 = vmatpush3.bf16.xpose.msra.mxu0 %v189_v25 }
  0x43   :  { %165 = vmatmul.mubr.f32.vlgmr.msra.gmra.mrb[0].mxu0 %v17_v26 }
 0x116   :  { %v100_v27 = vpop.f32.mrb[0].mxu0 }
 0x117   :  { %110 = vst [vmem:[%s268_s2] sm:$0xff] %v100_v27  ;;  %v166_v28 = vpop.f32.mrb[1].mxu0 }

</bundles_post_ra>
